<compile_context>
chip_gen: v7x
topology: tpu7x:2x2x1
jax: 0.10.0
libtpu: 0.0.40
codegen_flags: <defaults>
</compile_context>

<pallas_src>
import functools

import jax
import jax.numpy as jnp
from jax.experimental import pallas as pl
from jax.experimental.pallas import tpu as pltpu

IN_FEATURES = 15
GROUP = 8                          # samples packed per kernel row
ROW_WIDTH = GROUP * IN_FEATURES    # 120 lanes -> pads to 128 in VMEM


def _linear_kernel(x_ref, w_ref, b_ref, o_ref):
    # x_ref: (tile_rows, 120)  8 samples per row, natural HBM order (bitcast reshape)
    # w_ref: (120, 8)          block-diagonal replicated weight, VMEM resident
    # b_ref: (1, 1)            bias scalar in SMEM
    # o_ref: (tile_rows, 8)    column j of row r  ==  y[8*r + j]
    x = x_ref[...].astype(jnp.float32)   # no-op for f32, on-chip upcast for bf16
    o_ref[...] = (
        jnp.dot(x, w_ref[...], preferred_element_type=jnp.float32) + b_ref[0, 0]
    )


def _tpu_defaults():
    """(samples per grid step, use CORE_PARALLEL) picked per TPU generation."""
    try:
        kind = jax.devices()[0].device_kind.lower()
    except Exception:
        kind = ""
    if "7" in kind:                      # v7x: 2 TensorCores, ~3.2 TB/s HBM
        return 8192 * GROUP, True
    if "v6" in kind:                     # v6e: 32 MiB default scoped VMEM
        return 8192 * GROUP, False
    return 4096 * GROUP, False           # v5e & others: 16 MiB scoped VMEM


@functools.partial(jax.jit, static_argnames=("tile_n", "core_parallel"))
def _forward_impl(x, weight, bias, *, tile_n, core_parallel):
    lead = x.shape[:-1]
    x2 = x.reshape(-1, IN_FEATURES)
    n = x2.shape[0]

    n_grp = GROUP * pl.cdiv(n, GROUP)
    if n_grp != n:
        # TODO(synk): this pad costs one extra copy of x; feed batch sizes that
        # are multiples of 8 (or handle the <=7-row tail separately) to stay
        # zero-copy.  Padded rows evaluate to `bias` and are sliced off below.
        x2 = jnp.pad(x2, ((0, n_grp - n), (0, 0)))
    r = n_grp // GROUP
    # Row-major merge of 8 consecutive samples -> pure bitcast, no data movement.
    xg = x2.reshape(r, ROW_WIDTH)

    # Block-diagonal weight: w_big[j*15+k, j] = w[k], so (xg @ w_big)[row, j]
    # == dot(x[8*row + j, :], w).  960 floats, built once, resident in VMEM.
    w_col = weight.reshape(IN_FEATURES, 1).astype(jnp.float32)
    w_big = jnp.kron(jnp.eye(GROUP, dtype=jnp.float32), w_col)       # (120, 8)
    b2d = bias.reshape(1, 1).astype(jnp.float32)

    tile_rows = min(tile_n // GROUP, r)          # full-extent block for tiny batches
    grid = (pl.cdiv(r, tile_rows),)              # no padding; edge block is masked

    out = pl.pallas_call(
        _linear_kernel,
        out_shape=jax.ShapeDtypeStruct((r, GROUP), jnp.float32),
        grid=grid,
        in_specs=[
            pl.BlockSpec((tile_rows, ROW_WIDTH), lambda i: (i, 0)),   # streamed x
            pl.BlockSpec((ROW_WIDTH, GROUP), lambda i: (0, 0)),       # resident W
            pl.BlockSpec((1, 1), lambda i: (0, 0),
                         memory_space=pltpu.MemorySpace.SMEM),        # scalar bias
        ],
        out_specs=pl.BlockSpec((tile_rows, GROUP), lambda i: (i, 0)),
        compiler_params=pltpu.CompilerParams(
            dimension_semantics=(
                pltpu.CORE_PARALLEL if core_parallel else pltpu.PARALLEL,),
        ),
    )(xg, w_big, b2d)

    return out.reshape(n_grp, 1)[:n].reshape(*lead, 1)


def linear_regression_forward(x, weight, bias):
    """y = x @ weight.T + bias, matching nn.Linear(15, 1).  x: (..., 15) -> (..., 1)."""
    if x.shape[-1] != IN_FEATURES:
        raise ValueError(f"expected x[..., {IN_FEATURES}], got {x.shape}")
    if weight.shape != (1, IN_FEATURES):
        raise ValueError(f"expected weight of shape (1, {IN_FEATURES}), got {weight.shape}")
    if bias.shape != (1,):
        raise ValueError(f"expected bias of shape (1,), got {bias.shape}")
    tile_n, core_parallel = _tpu_defaults()
    return _forward_impl(x, weight, bias, tile_n=tile_n, core_parallel=core_parallel)


if __name__ == "__main__":
    key = jax.random.PRNGKey(0)
    k_x, k_w, k_b = jax.random.split(key, 3)

    weight = jax.random.uniform(k_w, (1, IN_FEATURES), dtype=jnp.float32,
                                minval=0.0, maxval=1.0)
    bias = jax.random.uniform(k_b, (1,), dtype=jnp.float32,
                              minval=0.0, maxval=1.0)

    for n in (8, 13):        # multiple-of-8 (zero-copy) and ragged batch
        x = jax.random.normal(k_x, (n, IN_FEATURES), dtype=jnp.float32)
        out = jax.block_until_ready(linear_regression_forward(x, weight, bias))
        # Exact elementwise f32 reference (no matmul-precision ambiguity).
        ref = jnp.sum(x * weight, axis=-1, keepdims=True) + bias
        assert out.shape == (n, 1)
        assert jnp.allclose(out, ref, atol=1e-4, rtol=1e-4), f"mismatch at n={n}"

    print("KERNEL_OK")
</pallas_src>

<mosaic_0001>
module attributes {stable_mosaic.version = 11 : i64} {
  func.func @_linear_kernel(%arg0: i32, %arg1: memref<1x120xf32, #tpu.memory_space<vmem>>, %arg2: memref<120x8xf32, #tpu.memory_space<vmem>>, %arg3: memref<1x1xf32, #tpu.memory_space<smem>>, %arg4: memref<1x8xf32, #tpu.memory_space<vmem>>) attributes {dimension_semantics = [#tpu.dimension_semantics<parallel>], iteration_bounds = array<i64: 1>, scalar_prefetch = 0 : i64, scratch_operands = 0 : i64, tpu.core_type = #tpu.core_type<tc>, window_params = [{transform_indices = @transform_0, window_bounds = array<i64: 1, 120>}, {pipeline_mode = #tpu.pipeline_mode<synchronous>, transform_indices = @transform_1, window_bounds = array<i64: 120, 8>}, {transform_indices = @transform_2, window_bounds = array<i64: 1, 1>}, {transform_indices = @transform_3, window_bounds = array<i64: 1, 8>}]} {
    %c0 = arith.constant 0 : index
    %c0_0 = arith.constant 0 : index
    %0 = vector.load %arg1[%c0, %c0_0] : memref<1x120xf32, #tpu.memory_space<vmem>>, vector<1x120xf32>
    %c0_1 = arith.constant 0 : index
    %c0_2 = arith.constant 0 : index
    %1 = vector.load %arg2[%c0_1, %c0_2] : memref<120x8xf32, #tpu.memory_space<vmem>>, vector<120x8xf32>
    %cst = arith.constant dense<0.000000e+00> : vector<1x8xf32>
    %2 = tpu.matmul %0, %1, %cst {dimension_numbers = #tpu.dot_dimension_numbers<[1], [0], [0], [1], [0, 0, 1, 1], [], []>} : vector<1x120xf32>, vector<120x8xf32>, vector<1x8xf32> -> vector<1x8xf32>
    %c0_3 = arith.constant 0 : index
    %c0_4 = arith.constant 0 : index
    %3 = memref.load %arg3[%c0_3, %c0_4] : memref<1x1xf32, #tpu.memory_space<smem>>
    %4 = vector.broadcast %3 : f32 to vector<1x8xf32>
    %5 = arith.addf %2, %4 : vector<1x8xf32>
    %c0_5 = arith.constant 0 : index
    %c0_6 = arith.constant 0 : index
    %6 = vector.load %arg4[%c0_5, %c0_6] : memref<1x8xf32, #tpu.memory_space<vmem>>, vector<1x8xf32>
    tpu.vector_store %arg4[%c0_5, %c0_6], %5 {strides = array<i32>} : memref<1x8xf32, #tpu.memory_space<vmem>>, vector<1x8xf32>,
    return
  }
  func.func @transform_0(%arg0: i32) -> (i32, i32) {
    %c0_i32 = arith.constant 0 : i32
    %c0_i32_0 = arith.constant 0 : i32
    return %arg0, %c0_i32 : i32, i32
  }
  func.func @transform_1(%arg0: i32) -> (i32, i32) {
    %c0_i32 = arith.constant 0 : i32
    %c0_i32_0 = arith.constant 0 : i32
    %c0_i32_1 = arith.constant 0 : i32
    return %c0_i32, %c0_i32_0 : i32, i32
  }
  func.func @transform_2(%arg0: i32) -> (i32, i32) {
    %c0_i32 = arith.constant 0 : i32
    %c0_i32_0 = arith.constant 0 : i32
    %c0_i32_1 = arith.constant 0 : i32
    return %c0_i32, %c0_i32_0 : i32, i32
  }
  func.func @transform_3(%arg0: i32) -> (i32, i32) {
    %c0_i32 = arith.constant 0 : i32
    %c0_i32_0 = arith.constant 0 : i32
    return %arg0, %c0_i32 : i32, i32
  }
}

</mosaic_0001>

<bundles_post_ra>
// kernel: _forward_impl.1
= control target key start
LH: loop header
LB: loop body
LE: loop exit
PB: predicated region body
PF: predicated region fallthrough
CT: control target
= control target key end

     0   :  { %v223_v3 = vmov 0.0|0.0   ;;  %vm224_vm0 = vmmov 0   ;;  %v225_v6 = vmov 0.0   ;;  %s310_s0 = inlined_call_operand.vmem [shape: f32[1,120], index: 0, kind: input, shape index: {}]   ;;  %s311_s1 = inlined_call_operand.vmem [shape: f32[120,8], index: 1, kind: input, shape index: {}]   ;;  %s312_s2 = inlined_call_operand.<no memory space> [shape: f32[1,1], index: 2, kind: input, shape index: {}]   ;;  %s313_s3 = inlined_call_operand.hbm [shape: f32[1,8], index: 3, kind: output, shape index: {}]  }
   0x1   :  { %v17_v0 = vld [vmem:[%s311_s1] sm:$0xff]  ;;  %v18_v1 = vld [vmem:[%s311_s1 + $0x8] sm:$0xff]  ;;  %v19_v2 = vld [vmem:[%s311_s1 + $0x10] sm:$0xff]  ;;  %174 = vmatprep.subr.bf16.mxu0 %v223_v3  ;;  %171 = vmatprep.mubr.msk.f32.mxu0 %vm224_vm0, %v225_v6 }
   0x2   :  { %v175_v4 = vpack.c.bf16 %v18_v1, %v17_v0  ;;  %v20_v5 = vld [vmem:[%s311_s1 + $0x18] sm:$0xff]  ;;  %v21_v8 = vld [vmem:[%s311_s1 + $0x20] sm:$0xff]  ;;  %v22_v9 = vld [vmem:[%s311_s1 + $0x28] sm:$0xff] }
   0x3   :  { %v178_v7 = vpack.c.bf16 %v20_v5, %v19_v2 }
   0x4   :  { %176 = vmatpush3.bf16.msra.mxu0 %v175_v4 }
   0x5   :  { %177 = vmatprep.subr.bf16.mxu0 %v223_v3 }
   0x6   :  { %9 = vsyncpa [#allocation4], 0  ;;  %v181_v10 = vpack.c.bf16 %v22_v9, %v21_v8  ;;  %v23_v11 = vld [vmem:[%s311_s1 + $0x30] sm:$0xff]  ;;  %v24_v12 = vld [vmem:[%s311_s1 + $0x38] sm:$0xff]  ;;  %vm34_vm1 = vcmask 982016   ;;  %v33_v25 = vstv %s312_s2  ;;  %s226_s19 = smov [#allocation3]  }
   0x7   :  { %v184_v13 = vpack.c.bf16 %v24_v12, %v23_v11  ;;  %v25_v14 = vld [vmem:[%s311_s1 + $0x40] sm:$0xff]  ;;  %v26_v15 = vld [vmem:[%s311_s1 + $0x48] sm:$0xff]  ;;  %v27_v17 = vld [vmem:[%s311_s1 + $0x50] sm:$0xff]  ;;  %s116_s20 = sshll.u32 %s226_s19, 4  ;;  %vm108_vm2 = vcmask 57344   ;;  %s117_s20 = int_to_ptr.vmem [resolvable:$true] %s116_s20 }
   0x8   :  { %179 = vmatpush3.bf16.msra.mxu0 %v178_v7  ;;  %v187_v16 = vpack.c.bf16 %v26_v15, %v25_v14  ;;  %v28_v18 = vld [vmem:[%s311_s1 + $0x58] sm:$0xff]  ;;  %v29_v20 = vld [vmem:[%s311_s1 + $0x60] sm:$0xff]  ;;  %v30_v21 = vld [vmem:[%s311_s1 + $0x68] sm:$0xff]  ;;  %s203_s21 = scalar_lea.vmem %s117_s20, 32  ;;  %p204_p1 = scmp.lt.s32.totalorder %s117_s20, %s117_s20 }
   0x9   :  { %180 = vmatprep.subr.bf16.mxu0 %v223_v3  ;;  %v190_v19 = vpack.c.bf16 %v28_v18, %v27_v17  ;;  %v193_v22 = vpack.c.bf16 %v30_v21, %v29_v20  ;;  %v31_v23 = vld [vmem:[%s311_s1 + $0x70] sm:$0xff]  ;;  %v16_v24 = vld [vmem:[%s310_s0] sm:$0x1]  ;;  %s199_s1 = scalar_lea.vmem %s117_s20, 16 }
   0xa   :  { %p200_p0 = scmp.ne.s32.totalorder %s117_s20, %s199_s1  ;;  %p205_p2 = scmp.lt.s32.totalorder %s203_s21, %s199_s1 }
   0xc   :  { %182 = vmatpush3.bf16.msra.mxu0 %v181_v10  ;;  %p206_p3 = por %p205_p2, %p204_p1 }
   0xd   :  { %183 = vmatprep.subr.bf16.mxu0 %v223_v3 }
   0xe   :  { %p207_p4 = pnand %p206_p3, %p200_p0 }
  0x10   :  { %185 = vmatpush3.bf16.msra.mxu0 %v184_v13 }
  0x11   :  { %186 = vmatprep.subr.bf16.mxu0 %v223_v3 }
  0x14   :  { %188 = vmatpush3.bf16.msra.mxu0 %v187_v16 }
  0x15   :  { %189 = vmatprep.subr.bf16.mxu0 %v223_v3 }
  0x18   :  { %191 = vmatpush3.bf16.msra.mxu0 %v190_v19 }
  0x19   :  { %192 = vmatprep.subr.bf16.mxu0 %v223_v3 }
  0x1c   :  { %194 = vmatpush3.bf16.msra.mxu0 %v193_v22 }
  0x1d   :  { %169 = vmatprep.subr.mxu0 %v225_v6 }
  0x20   :  { %170 = vmatpush3.msra.mxu0 %v31_v23 }
  0x21   :  { %172 = vmatmul.mubr.msk.f32.vlgmr.msra.gmra.mrb[0].mxu0 %vm34_vm1, %v16_v24 }
  0xf4   :  { %v104_v26 = vpop.f32.mrb[0].mxu0 }
  0xf5   :  { %v105_v27 = vadd.f32 %v104_v26, %v33_v25  ;;  %v173_v28 = vpop.f32.mrb[1].mxu0 }
  0xf7   :  { %109 = vst.msk [vmem:[#allocation3] sm:$0x1] %vm108_vm2, %v105_v27 }
  0xf8   :  { %210 = shalt.err (!%p207_p4)
}
  0xf9   :  { %s211_s2 = scalar_lea.hbm %s313_s3, 16 }
  0xfa   :  { %p212_p5 = scmp.ne.s32.totalorder %s313_s3, %s211_s2  ;;  %p215_p6 = scmp.lt.u32.totalorder %s211_s2, %s313_s3 }
  0xfc   :  { %p217_p7 = pnand %p215_p6, %p212_p5 }
  0xfe   :  { %220 = shalt.err (!%p217_p7)
}
  0xff   :  { %119 = dma.vmem_to_hbm [thread:$0]  %s117_s20, 16, %s313_s3, [#allocation4]  }
 0x100   :  { %221 = dma.done.wait [#allocation4], 16  }
 0x101   :  { %222 = vsyncadd [#allocation4], 4294967280 }
 0x102   :  { %123 = vsyncpa [#allocation4], 1 }

</bundles_post_ra>
